<compile_context>
chip_gen: v5e
topology: v5e:2x2
jax: 0.10.0
libtpu: 0.0.40
codegen_flags: <defaults>
</compile_context>

<pallas_src>
import math

import jax
import jax.numpy as jnp
from jax import lax
from jax.experimental import pallas as pl
from jax.experimental.pallas import tpu as pltpu

# ---- model hyper-parameters (small, consistent with the module) -------------
EMBED = 32          # embed_size
HEADS = 4           # heads
HEAD_DIM = EMBED // HEADS
FF = 4 * EMBED      # forward_expansion * embed_size
SEQ = 8             # sequence length
BATCH = 2
NS = BATCH * SEQ    # collapsed (batch, seq) row count
VOCAB = 50          # src_vocab_size
MAX_LEN = 16        # max_length
LN_EPS = 1e-5
SCALE = 1.0 / math.sqrt(EMBED)        # torch: energy / sqrt(embed_size)

# power-of-two sizes let the in-kernel index math use shifts/ands
assert SEQ & (SEQ - 1) == 0
assert NS & (NS - 1) == 0
assert HEAD_DIM & (HEAD_DIM - 1) == 0

# ---- packed-parameter row layout (everything (., EMBED)-shaped) --------------
EMB_ROWS = 64                         # VOCAB + SEQ = 58, padded to 64
assert EMB_ROWS >= VOCAB + SEQ
EMB_OFF = 0                           # [word_emb (50) ; pos_emb[:SEQ] (8) ; 0s]
WQ_OFF = EMB_OFF + EMB_ROWS           # block-diag kron(I_H, Wq.T) * SCALE
WK_OFF = WQ_OFF + EMBED
WV_OFF = WK_OFF + EMBED
WFC_OFF = WV_OFF + EMBED              # Wfc.T
W1_OFF = WFC_OFF + EMBED              # W1 in natural (FF, E) layout (contract dim 1)
W2T_OFF = W1_OFF + FF                 # W2.T  (FF, E)
PACK_ROWS = W2T_OFF + FF              # 448

# additive-bias sentinels (scale folded into Q weights, so bias is pre-scaled):
#   masked same-batch key  -> -1e20*SCALE  (matches masked_fill-before-scale)
#   cross-batch pair       -> -2e20*SCALE  (strictly more negative, so even a
#     fully-masked row still attends only within its own sequence)
NEG_MASKED = -1e20 * SCALE
NEG_CROSS = -2e20 * SCALE


# ---------------------------- Pallas kernel ----------------------------------
def encoder_block_kernel(tok_ref, maskf_ref, pack_ref, vec_ref, bb1_ref, o_ref):
    f32 = jnp.float32
    ns = tok_ref.shape[0]                     # static at trace time
    hns = HEADS * ns
    log2_ns = ns.bit_length() - 1
    log2_hd = HEAD_DIM.bit_length() - 1
    log2_seq = SEQ.bit_length() - 1

    # ---- fused embedding gather: one-hot @ [word_emb ; pos_emb] (one matmul) --
    tok = tok_ref[...]                                        # (NS, 1) int32
    col_e = lax.broadcasted_iota(jnp.int32, (ns, EMB_ROWS), 1)
    row_e = lax.broadcasted_iota(jnp.int32, (ns, EMB_ROWS), 0)
    pos_slot = VOCAB + (row_e & (SEQ - 1))                    # position = row % SEQ
    onehot = jnp.logical_or(col_e == tok, col_e == pos_slot).astype(f32)
    emb_tbl = pack_ref[EMB_OFF:EMB_OFF + EMB_ROWS, :]         # (64, E)
    x = jnp.dot(onehot, emb_tbl, preferred_element_type=f32)  # (NS, E)
    # dropout(word_emb + pos_emb): identity in eval mode

    # ---- Q/K/V projections (block-diag kron weights; 1/sqrt(E) folded into Q) -
    q = jnp.dot(x, pack_ref[WQ_OFF:WQ_OFF + EMBED, :], preferred_element_type=f32)
    k = jnp.dot(x, pack_ref[WK_OFF:WK_OFF + EMBED, :], preferred_element_type=f32)
    v = jnp.dot(x, pack_ref[WV_OFF:WV_OFF + EMBED, :], preferred_element_type=f32)

    # ---- heads stacked on the sublane axis: one energy/softmax/PV pass -------
    # big head mask (H*NS, E): row-block h keeps only lanes [h*D, (h+1)*D)
    rr = lax.broadcasted_iota(jnp.int32, (hns, EMBED), 0)
    cc = lax.broadcasted_iota(jnp.int32, (hns, EMBED), 1)
    bhm = ((rr >> log2_ns) == (cc >> log2_hd)).astype(f32)

    qs = jnp.concatenate([q] * HEADS, axis=0) * bhm           # (H*NS, E)
    # energies for all heads at once: e[h*NS+i, j] = <q_h[i], k_h[j]>
    e = lax.dot_general(qs, k, (((1,), (1,)), ((), ())),
                        preferred_element_type=f32)           # (H*NS, NS)

    # additive bias built in-kernel: key mask + cross-batch blocking
    rb = lax.broadcasted_iota(jnp.int32, (hns, ns), 0)
    cb = lax.broadcasted_iota(jnp.int32, (hns, ns), 1)
    same_batch = ((rb & (ns - 1)) >> log2_seq) == (cb >> log2_seq)
    key_masked = maskf_ref[...] == 0.0                        # (1, NS), broadcasts
    bias = jnp.where(same_batch,
                     jnp.where(key_masked, NEG_MASKED, 0.0),
                     NEG_CROSS)
    e = e + bias
    e = e - jnp.max(e, axis=-1, keepdims=True)
    p = jnp.exp(e)
    attn = p / jnp.sum(p, axis=-1, keepdims=True)             # exact normalize

    pv = jnp.dot(attn, v, preferred_element_type=f32) * bhm   # (H*NS, E)
    # head "concat": masked per-head results occupy disjoint lanes -> just add
    att_cat = pv[0:ns, :]
    for h in range(1, HEADS):
        att_cat = att_cat + pv[h * ns:(h + 1) * ns, :]        # (NS, E)

    final = jnp.dot(att_cat, pack_ref[WFC_OFF:WFC_OFF + EMBED, :],
                    preferred_element_type=f32)

    vec = vec_ref[...]                                        # (8, E)
    g1, b1, g2, b2, bb2 = vec[0:1], vec[1:2], vec[2:3], vec[3:4], vec[4:5]

    # norm1(attention + query)        (dropout = identity in eval mode)
    y = final + x
    mu = jnp.mean(y, axis=-1, keepdims=True)
    var = jnp.mean((y - mu) ** 2, axis=-1, keepdims=True)
    x1 = (y - mu) * lax.rsqrt(var + LN_EPS) * g1 + b1

    # feed-forward: Linear -> ReLU -> Linear
    h1 = lax.dot_general(x1, pack_ref[W1_OFF:W1_OFF + FF, :],
                         (((1,), (1,)), ((), ())),
                         preferred_element_type=f32) + bb1_ref[...]
    h1 = jnp.maximum(h1, 0.0)
    fw = jnp.dot(h1, pack_ref[W2T_OFF:W2T_OFF + FF, :],
                 preferred_element_type=f32) + bb2

    # norm2(fw + x1)
    y2 = fw + x1
    mu2 = jnp.mean(y2, axis=-1, keepdims=True)
    var2 = jnp.mean((y2 - mu2) ** 2, axis=-1, keepdims=True)
    o_ref[...] = (y2 - mu2) * lax.rsqrt(var2 + LN_EPS) * g2 + b2


# ------------------------- one-time param packing -----------------------------
def prepare_params(params):
    """Parameter-only transforms, done ONCE (not inside the per-call jit)."""
    eye = jnp.eye(HEADS, dtype=jnp.float32)
    wqb = jnp.kron(eye, params["wq"].T) * SCALE    # scale folded into Q weights
    wkb = jnp.kron(eye, params["wk"].T)
    wvb = jnp.kron(eye, params["wv"].T)
    wfcT = params["wfc"].T
    w1 = params["w1"]                              # (FF, E), contracted on dim 1
    w2T = params["w2"].T                           # (FF, E)

    emb_cat = jnp.zeros((EMB_ROWS, EMBED), jnp.float32)
    emb_cat = emb_cat.at[:VOCAB].set(params["word_emb"])
    emb_cat = emb_cat.at[VOCAB:VOCAB + SEQ].set(params["pos_emb"][:SEQ])

    big_pack = jnp.concatenate([emb_cat, wqb, wkb, wvb, wfcT, w1, w2T], axis=0)
    assert big_pack.shape == (PACK_ROWS, EMBED)

    vec_pack = jnp.zeros((8, EMBED), jnp.float32)
    vec_pack = (vec_pack.at[0].set(params["g1"][0])
                        .at[1].set(params["b1"][0])
                        .at[2].set(params["g2"][0])
                        .at[3].set(params["b2"][0])
                        .at[4].set(params["bb2"][0]))

    return {"big_pack": big_pack, "vec_pack": vec_pack, "bb1": params["bb1"]}


# ------------------------------ wrapper ---------------------------------------
@jax.jit
def encoder_forward(tokens, mask, packed):
    N, S = tokens.shape
    ns = N * S
    tok2d = tokens.reshape(ns, 1).astype(jnp.int32)
    maskf = mask.reshape(1, ns).astype(jnp.float32)

    vmem = pl.BlockSpec(memory_space=pltpu.MemorySpace.VMEM)
    out2d = pl.pallas_call(
        encoder_block_kernel,
        out_shape=jax.ShapeDtypeStruct((ns, EMBED), jnp.float32),
        in_specs=[vmem] * 5,
        out_specs=vmem,
    )(tok2d, maskf, packed["big_pack"], packed["vec_pack"], packed["bb1"])
    return out2d.reshape(N, S, EMBED)


# ----------------------- pure-JAX reference (for checking) --------------------
def reference_forward(tokens, mask, params):
    N, S = tokens.shape
    x = (params["word_emb"][tokens]
         + params["pos_emb"][jnp.arange(S)][None, :, :]).astype(jnp.float32)
    xh = x.reshape(N, S, HEADS, HEAD_DIM)
    q = jnp.einsum("nshd,od->nsho", xh, params["wq"])
    k = jnp.einsum("nshd,od->nsho", xh, params["wk"])
    v = jnp.einsum("nshd,od->nsho", xh, params["wv"])
    energy = jnp.einsum("nqhd,nkhd->nhqk", q, k)
    m = mask.astype(jnp.float32).reshape(N, 1, 1, S)
    energy = jnp.where(m == 0.0, -1e20, energy)
    attn = jax.nn.softmax(energy / math.sqrt(EMBED), axis=3)
    out = jnp.einsum("nhqk,nkhd->nqhd", attn, v).reshape(N, S, EMBED)
    final = out @ params["wfc"].T

    def ln(z, g, b):
        mu = jnp.mean(z, -1, keepdims=True)
        var = jnp.mean((z - mu) ** 2, -1, keepdims=True)
        return (z - mu) * lax.rsqrt(var + LN_EPS) * g + b

    x1 = ln(final + x, params["g1"][0], params["b1"][0])
    h1 = jnp.maximum(x1 @ params["w1"].T + params["bb1"][0], 0.0)
    fw = h1 @ params["w2"].T + params["bb2"][0]
    return ln(fw + x1, params["g2"][0], params["b2"][0])


# ------------------------------ param init ------------------------------------
def init_params(key):
    ks = jax.random.split(key, 10)
    s = 0.02
    return {
        "word_emb": jax.random.normal(ks[0], (VOCAB, EMBED), jnp.float32),
        "pos_emb": jax.random.normal(ks[1], (MAX_LEN, EMBED), jnp.float32),
        "wq": jax.random.normal(ks[2], (HEAD_DIM, HEAD_DIM), jnp.float32) * s,
        "wk": jax.random.normal(ks[3], (HEAD_DIM, HEAD_DIM), jnp.float32) * s,
        "wv": jax.random.normal(ks[4], (HEAD_DIM, HEAD_DIM), jnp.float32) * s,
        "wfc": jax.random.normal(ks[5], (EMBED, EMBED), jnp.float32) * s,
        "g1": jnp.ones((1, EMBED), jnp.float32),
        "b1": jnp.zeros((1, EMBED), jnp.float32),
        "g2": jnp.ones((1, EMBED), jnp.float32),
        "b2": jnp.zeros((1, EMBED), jnp.float32),
        "w1": jax.random.normal(ks[6], (FF, EMBED), jnp.float32) * s,
        "bb1": jax.random.normal(ks[7], (1, FF), jnp.float32) * s,
        "w2": jax.random.normal(ks[8], (EMBED, FF), jnp.float32) * s,
        "bb2": jax.random.normal(ks[9], (1, EMBED), jnp.float32) * s,
    }


if __name__ == "__main__":
    key = jax.random.PRNGKey(0)
    pkey, tkey = jax.random.split(key)
    params = init_params(pkey)
    packed = prepare_params(params)     # one-time parameter packing

    tokens = jax.random.randint(tkey, (BATCH, SEQ), 0, VOCAB, dtype=jnp.int32)
    # exercise the key-mask path: last two positions of batch 1 are padding
    mask = jnp.ones((BATCH, SEQ), jnp.float32).at[1, SEQ - 2:].set(0.0)

    out = encoder_forward(tokens, mask, packed)
    out = jax.block_until_ready(out)

    ref = reference_forward(tokens, mask, params)
    assert out.shape == (BATCH, SEQ, EMBED)
    assert jnp.allclose(out, ref, rtol=1e-4, atol=1e-4), "mismatch vs reference"

    print("KERNEL_OK")
</pallas_src>

<mosaic_0001>
module attributes {stable_mosaic.version = 11 : i64} {
  func.func @encoder_block_kernel(%arg0: memref<16x1xi32, #tpu.memory_space<vmem>>, %arg1: memref<1x16xf32, #tpu.memory_space<vmem>>, %arg2: memref<448x32xf32, #tpu.memory_space<vmem>>, %arg3: memref<8x32xf32, #tpu.memory_space<vmem>>, %arg4: memref<1x128xf32, #tpu.memory_space<vmem>>, %arg5: memref<16x32xf32, #tpu.memory_space<vmem>>) attributes {dimension_semantics = [], scalar_prefetch = 0 : i64, scratch_operands = 0 : i64, tpu.core_type = #tpu.core_type<tc>} {
    %c0 = arith.constant 0 : index
    %c0_0 = arith.constant 0 : index
    %0 = vector.load %arg0[%c0, %c0_0] : memref<16x1xi32, #tpu.memory_space<vmem>>, vector<16x1xi32>
    %1 = tpu.iota {dimensions = array<i32: 1>} : vector<16x64xi32>
    %2 = tpu.iota {dimensions = array<i32: 0>} : vector<16x64xi32>
    %c7_i32 = arith.constant 7 : i32
    %3 = vector.broadcast %c7_i32 : i32 to vector<16x64xi32>
    %4 = arith.andi %2, %3 : vector<16x64xi32>
    %c50_i32 = arith.constant 50 : i32
    %5 = vector.broadcast %c50_i32 : i32 to vector<16x64xi32>
    %6 = arith.addi %5, %4 : vector<16x64xi32>
    %7 = vector.broadcast %0 : vector<16x1xi32> to vector<16x64xi32>
    %8 = arith.cmpi eq, %1, %7 : vector<16x64xi32>
    %9 = arith.cmpi eq, %1, %6 : vector<16x64xi32>
    %10 = arith.ori %8, %9 : vector<16x64xi1>
    %11 = arith.extui %10 : vector<16x64xi1> to vector<16x64xi32>
    %12 = arith.sitofp %11 : vector<16x64xi32> to vector<16x64xf32>
    %c0_1 = arith.constant 0 : index
    %c0_2 = arith.constant 0 : index
    %13 = vector.load %arg2[%c0_1, %c0_2] : memref<448x32xf32, #tpu.memory_space<vmem>>, vector<64x32xf32>
    %cst = arith.constant dense<0.000000e+00> : vector<16x32xf32>
    %14 = tpu.matmul %12, %13, %cst {dimension_numbers = #tpu.dot_dimension_numbers<[1], [0], [0], [1], [0, 0, 1, 1], [], []>} : vector<16x64xf32>, vector<64x32xf32>, vector<16x32xf32> -> vector<16x32xf32>
    %c64 = arith.constant 64 : index
    %c0_3 = arith.constant 0 : index
    %15 = vector.load %arg2[%c64, %c0_3] : memref<448x32xf32, #tpu.memory_space<vmem>>, vector<32x32xf32>
    %cst_4 = arith.constant dense<0.000000e+00> : vector<16x32xf32>
    %16 = tpu.matmul %14, %15, %cst_4 {dimension_numbers = #tpu.dot_dimension_numbers<[1], [0], [0], [1], [0, 0, 1, 1], [], []>} : vector<16x32xf32>, vector<32x32xf32>, vector<16x32xf32> -> vector<16x32xf32>
    %c96 = arith.constant 96 : index
    %c0_5 = arith.constant 0 : index
    %17 = vector.load %arg2[%c96, %c0_5] : memref<448x32xf32, #tpu.memory_space<vmem>>, vector<32x32xf32>
    %cst_6 = arith.constant dense<0.000000e+00> : vector<16x32xf32>
    %18 = tpu.matmul %14, %17, %cst_6 {dimension_numbers = #tpu.dot_dimension_numbers<[1], [0], [0], [1], [0, 0, 1, 1], [], []>} : vector<16x32xf32>, vector<32x32xf32>, vector<16x32xf32> -> vector<16x32xf32>
    %c128 = arith.constant 128 : index
    %c0_7 = arith.constant 0 : index
    %19 = vector.load %arg2[%c128, %c0_7] : memref<448x32xf32, #tpu.memory_space<vmem>>, vector<32x32xf32>
    %cst_8 = arith.constant dense<0.000000e+00> : vector<16x32xf32>
    %20 = tpu.matmul %14, %19, %cst_8 {dimension_numbers = #tpu.dot_dimension_numbers<[1], [0], [0], [1], [0, 0, 1, 1], [], []>} : vector<16x32xf32>, vector<32x32xf32>, vector<16x32xf32> -> vector<16x32xf32>
    %21 = tpu.iota {dimensions = array<i32: 0>} : vector<64x32xi32>
    %22 = tpu.iota {dimensions = array<i32: 1>} : vector<64x32xi32>
    %c4_i32 = arith.constant 4 : i32
    %23 = vector.broadcast %c4_i32 : i32 to vector<64x32xi32>
    %24 = arith.shrsi %21, %23 : vector<64x32xi32>
    %c3_i32 = arith.constant 3 : i32
    %25 = vector.broadcast %c3_i32 : i32 to vector<64x32xi32>
    %26 = arith.shrsi %22, %25 : vector<64x32xi32>
    %27 = arith.cmpi eq, %24, %26 : vector<64x32xi32>
    %28 = arith.extui %27 : vector<64x32xi1> to vector<64x32xi32>
    %29 = arith.sitofp %28 : vector<64x32xi32> to vector<64x32xf32>
    %30 = tpu.concatenate %16, %16, %16, %16 in 0 : vector<16x32xf32>, vector<16x32xf32>, vector<16x32xf32>, vector<16x32xf32> -> vector<64x32xf32>
    %31 = arith.mulf %30, %29 : vector<64x32xf32>
    %cst_9 = arith.constant dense<0.000000e+00> : vector<64x16xf32>
    %32 = tpu.matmul %31, %18, %cst_9 {dimension_numbers = #tpu.dot_dimension_numbers<[1], [1], [0], [0], [0, 0, 1, 0], [], []>} : vector<64x32xf32>, vector<16x32xf32>, vector<64x16xf32> -> vector<64x16xf32>
    %33 = tpu.iota {dimensions = array<i32: 0>} : vector<64x16xi32>
    %34 = tpu.iota {dimensions = array<i32: 1>} : vector<64x16xi32>
    %c15_i32 = arith.constant 15 : i32
    %35 = vector.broadcast %c15_i32 : i32 to vector<64x16xi32>
    %36 = arith.andi %33, %35 : vector<64x16xi32>
    %c3_i32_10 = arith.constant 3 : i32
    %37 = vector.broadcast %c3_i32_10 : i32 to vector<64x16xi32>
    %38 = arith.shrsi %36, %37 : vector<64x16xi32>
    %c3_i32_11 = arith.constant 3 : i32
    %39 = vector.broadcast %c3_i32_11 : i32 to vector<64x16xi32>
    %40 = arith.shrsi %34, %39 : vector<64x16xi32>
    %41 = arith.cmpi eq, %38, %40 : vector<64x16xi32>
    %c0_12 = arith.constant 0 : index
    %c0_13 = arith.constant 0 : index
    %42 = vector.load %arg1[%c0_12, %c0_13] : memref<1x16xf32, #tpu.memory_space<vmem>>, vector<1x16xf32>
    %cst_14 = arith.constant 0.000000e+00 : f32
    %43 = vector.broadcast %cst_14 : f32 to vector<1x16xf32>
    %44 = arith.cmpf oeq, %42, %43 : vector<1x16xf32>
    %cst_15 = arith.constant -1.76776698E+19 : f32
    %cst_16 = arith.constant 0.000000e+00 : f32
    %45 = vector.broadcast %cst_15 : f32 to vector<1x16xf32>
    %46 = vector.broadcast %cst_16 : f32 to vector<1x16xf32>
    %47 = arith.select %44, %45, %46 : vector<1x16xi1>, vector<1x16xf32>
    %cst_17 = arith.constant -3.53553395E+19 : f32
    %48 = vector.shape_cast %47 : vector<1x16xf32> to vector<1x16xf32>
    %49 = vector.broadcast %48 : vector<1x16xf32> to vector<64x16xf32>
    %50 = vector.broadcast %cst_17 : f32 to vector<64x16xf32>
    %51 = arith.select %41, %49, %50 : vector<64x16xi1>, vector<64x16xf32>
    %52 = arith.addf %32, %51 : vector<64x16xf32>
    %cst_18 = arith.constant dense<0xFF800000> : vector<64xf32>
    %53 = vector.multi_reduction <maximumf>, %52, %cst_18 [1] : vector<64x16xf32> to vector<64xf32>
    %54 = vector.shape_cast %53 : vector<64xf32> to vector<64x1xf32>
    %55 = vector.broadcast %54 : vector<64x1xf32> to vector<64x16xf32>
    %56 = arith.subf %52, %55 : vector<64x16xf32>
    %57 = math.exp %56 : vector<64x16xf32>
    %cst_19 = arith.constant dense<0.000000e+00> : vector<64xf32>
    %58 = vector.multi_reduction <add>, %57, %cst_19 [1] : vector<64x16xf32> to vector<64xf32>
    %59 = vector.shape_cast %58 : vector<64xf32> to vector<64x1xf32>
    %60 = vector.broadcast %59 : vector<64x1xf32> to vector<64x16xf32>
    %61 = arith.divf %57, %60 : vector<64x16xf32>
    %cst_20 = arith.constant dense<0.000000e+00> : vector<64x32xf32>
    %62 = tpu.matmul %61, %20, %cst_20 {dimension_numbers = #tpu.dot_dimension_numbers<[1], [0], [0], [1], [0, 0, 1, 1], [], []>} : vector<64x16xf32>, vector<16x32xf32>, vector<64x32xf32> -> vector<64x32xf32>
    %63 = arith.mulf %62, %29 : vector<64x32xf32>
    %64 = vector.extract_strided_slice %63 {offsets = [0, 0], sizes = [16, 32], strides = [1, 1]} : vector<64x32xf32> to vector<16x32xf32>
    %65 = vector.extract_strided_slice %63 {offsets = [16, 0], sizes = [16, 32], strides = [1, 1]} : vector<64x32xf32> to vector<16x32xf32>
    %66 = arith.addf %64, %65 : vector<16x32xf32>
    %67 = vector.extract_strided_slice %63 {offsets = [32, 0], sizes = [16, 32], strides = [1, 1]} : vector<64x32xf32> to vector<16x32xf32>
    %68 = arith.addf %66, %67 : vector<16x32xf32>
    %69 = vector.extract_strided_slice %63 {offsets = [48, 0], sizes = [16, 32], strides = [1, 1]} : vector<64x32xf32> to vector<16x32xf32>
    %70 = arith.addf %68, %69 : vector<16x32xf32>
    %c160 = arith.constant 160 : index
    %c0_21 = arith.constant 0 : index
    %71 = vector.load %arg2[%c160, %c0_21] : memref<448x32xf32, #tpu.memory_space<vmem>>, vector<32x32xf32>
    %cst_22 = arith.constant dense<0.000000e+00> : vector<16x32xf32>
    %72 = tpu.matmul %70, %71, %cst_22 {dimension_numbers = #tpu.dot_dimension_numbers<[1], [0], [0], [1], [0, 0, 1, 1], [], []>} : vector<16x32xf32>, vector<32x32xf32>, vector<16x32xf32> -> vector<16x32xf32>
    %c0_23 = arith.constant 0 : index
    %c0_24 = arith.constant 0 : index
    %73 = vector.load %arg3[%c0_23, %c0_24] : memref<8x32xf32, #tpu.memory_space<vmem>>, vector<8x32xf32>
    %74 = vector.extract_strided_slice %73 {offsets = [0, 0], sizes = [1, 32], strides = [1, 1]} : vector<8x32xf32> to vector<1x32xf32>
    %75 = vector.extract_strided_slice %73 {offsets = [1, 0], sizes = [1, 32], strides = [1, 1]} : vector<8x32xf32> to vector<1x32xf32>
    %76 = vector.extract_strided_slice %73 {offsets = [2, 0], sizes = [1, 32], strides = [1, 1]} : vector<8x32xf32> to vector<1x32xf32>
    %77 = vector.extract_strided_slice %73 {offsets = [3, 0], sizes = [1, 32], strides = [1, 1]} : vector<8x32xf32> to vector<1x32xf32>
    %78 = vector.extract_strided_slice %73 {offsets = [4, 0], sizes = [1, 32], strides = [1, 1]} : vector<8x32xf32> to vector<1x32xf32>
    %79 = arith.addf %72, %14 : vector<16x32xf32>
    %cst_25 = arith.constant dense<0.000000e+00> : vector<16xf32>
    %80 = vector.multi_reduction <add>, %79, %cst_25 [1] : vector<16x32xf32> to vector<16xf32>
    %81 = vector.shape_cast %80 : vector<16xf32> to vector<16x1xf32>
    %cst_26 = arith.constant 3.200000e+01 : f32
    %82 = vector.broadcast %cst_26 : f32 to vector<16x1xf32>
    %83 = arith.divf %81, %82 : vector<16x1xf32>
    %84 = vector.broadcast %83 : vector<16x1xf32> to vector<16x32xf32>
    %85 = arith.subf %79, %84 : vector<16x32xf32>
    %86 = arith.mulf %85, %85 : vector<16x32xf32>
    %cst_27 = arith.constant dense<0.000000e+00> : vector<16xf32>
    %87 = vector.multi_reduction <add>, %86, %cst_27 [1] : vector<16x32xf32> to vector<16xf32>
    %88 = vector.shape_cast %87 : vector<16xf32> to vector<16x1xf32>
    %cst_28 = arith.constant 3.200000e+01 : f32
    %89 = vector.broadcast %cst_28 : f32 to vector<16x1xf32>
    %90 = arith.divf %88, %89 : vector<16x1xf32>
    %91 = vector.broadcast %83 : vector<16x1xf32> to vector<16x32xf32>
    %92 = arith.subf %79, %91 : vector<16x32xf32>
    %cst_29 = arith.constant 9.99999974E-6 : f32
    %93 = vector.broadcast %cst_29 : f32 to vector<16x1xf32>
    %94 = arith.addf %90, %93 : vector<16x1xf32>
    %95 = math.rsqrt %94 : vector<16x1xf32>
    %96 = vector.broadcast %95 : vector<16x1xf32> to vector<16x32xf32>
    %97 = arith.mulf %92, %96 : vector<16x32xf32>
    %98 = vector.broadcast %74 : vector<1x32xf32> to vector<16x32xf32>
    %99 = arith.mulf %97, %98 : vector<16x32xf32>
    %100 = vector.broadcast %75 : vector<1x32xf32> to vector<16x32xf32>
    %101 = arith.addf %99, %100 : vector<16x32xf32>
    %c192 = arith.constant 192 : index
    %c0_30 = arith.constant 0 : index
    %102 = vector.load %arg2[%c192, %c0_30] : memref<448x32xf32, #tpu.memory_space<vmem>>, vector<128x32xf32>
    %cst_31 = arith.constant dense<0.000000e+00> : vector<16x128xf32>
    %103 = tpu.matmul %101, %102, %cst_31 {dimension_numbers = #tpu.dot_dimension_numbers<[1], [1], [0], [0], [0, 0, 1, 0], [], []>} : vector<16x32xf32>, vector<128x32xf32>, vector<16x128xf32> -> vector<16x128xf32>
    %c0_32 = arith.constant 0 : index
    %c0_33 = arith.constant 0 : index
    %104 = vector.load %arg4[%c0_32, %c0_33] : memref<1x128xf32, #tpu.memory_space<vmem>>, vector<1x128xf32>
    %105 = vector.broadcast %104 : vector<1x128xf32> to vector<16x128xf32>
    %106 = arith.addf %103, %105 : vector<16x128xf32>
    %cst_34 = arith.constant 0.000000e+00 : f32
    %107 = vector.broadcast %cst_34 : f32 to vector<16x128xf32>
    %108 = arith.maximumf %106, %107 : vector<16x128xf32>
    %c320 = arith.constant 320 : index
    %c0_35 = arith.constant 0 : index
    %109 = vector.load %arg2[%c320, %c0_35] : memref<448x32xf32, #tpu.memory_space<vmem>>, vector<128x32xf32>
    %cst_36 = arith.constant dense<0.000000e+00> : vector<16x32xf32>
    %110 = tpu.matmul %108, %109, %cst_36 {dimension_numbers = #tpu.dot_dimension_numbers<[1], [0], [0], [1], [0, 0, 1, 1], [], []>} : vector<16x128xf32>, vector<128x32xf32>, vector<16x32xf32> -> vector<16x32xf32>
    %111 = vector.broadcast %78 : vector<1x32xf32> to vector<16x32xf32>
    %112 = arith.addf %110, %111 : vector<16x32xf32>
    %113 = arith.addf %112, %101 : vector<16x32xf32>
    %cst_37 = arith.constant dense<0.000000e+00> : vector<16xf32>
    %114 = vector.multi_reduction <add>, %113, %cst_37 [1] : vector<16x32xf32> to vector<16xf32>
    %115 = vector.shape_cast %114 : vector<16xf32> to vector<16x1xf32>
    %cst_38 = arith.constant 3.200000e+01 : f32
    %116 = vector.broadcast %cst_38 : f32 to vector<16x1xf32>
    %117 = arith.divf %115, %116 : vector<16x1xf32>
    %118 = vector.broadcast %117 : vector<16x1xf32> to vector<16x32xf32>
    %119 = arith.subf %113, %118 : vector<16x32xf32>
    %120 = arith.mulf %119, %119 : vector<16x32xf32>
    %cst_39 = arith.constant dense<0.000000e+00> : vector<16xf32>
    %121 = vector.multi_reduction <add>, %120, %cst_39 [1] : vector<16x32xf32> to vector<16xf32>
    %122 = vector.shape_cast %121 : vector<16xf32> to vector<16x1xf32>
    %cst_40 = arith.constant 3.200000e+01 : f32
    %123 = vector.broadcast %cst_40 : f32 to vector<16x1xf32>
    %124 = arith.divf %122, %123 : vector<16x1xf32>
    %125 = vector.broadcast %117 : vector<16x1xf32> to vector<16x32xf32>
    %126 = arith.subf %113, %125 : vector<16x32xf32>
    %cst_41 = arith.constant 9.99999974E-6 : f32
    %127 = vector.broadcast %cst_41 : f32 to vector<16x1xf32>
    %128 = arith.addf %124, %127 : vector<16x1xf32>
    %129 = math.rsqrt %128 : vector<16x1xf32>
    %130 = vector.broadcast %129 : vector<16x1xf32> to vector<16x32xf32>
    %131 = arith.mulf %126, %130 : vector<16x32xf32>
    %132 = vector.broadcast %76 : vector<1x32xf32> to vector<16x32xf32>
    %133 = arith.mulf %131, %132 : vector<16x32xf32>
    %134 = vector.broadcast %77 : vector<1x32xf32> to vector<16x32xf32>
    %135 = arith.addf %133, %134 : vector<16x32xf32>
    %c0_42 = arith.constant 0 : index
    %c0_43 = arith.constant 0 : index
    %136 = vector.load %arg5[%c0_42, %c0_43] : memref<16x32xf32, #tpu.memory_space<vmem>>, vector<16x32xf32>
    tpu.vector_store %arg5[%c0_42, %c0_43], %135 {strides = array<i32>} : memref<16x32xf32, #tpu.memory_space<vmem>>, vector<16x32xf32>,
    return
  }
}

</mosaic_0001>

<bundles_post_ra>
// kernel: encoder_forward.1
= control target key start
LH: loop header
LB: loop body
LE: loop exit
PB: predicated region body
PF: predicated region fallthrough
CT: control target
= control target key end

     0   :  { %v1036_v2 = vmov 0   ;;  %s1489_s0 = inlined_call_operand.vmem [shape: s32[16,1], index: 0, kind: input, shape index: {}]   ;;  %s1490_s1 = inlined_call_operand.vmem [shape: f32[1,16], index: 1, kind: input, shape index: {}]   ;;  %s1491_s2 = inlined_call_operand.vmem [shape: f32[448,32], index: 2, kind: input, shape index: {}]   ;;  %s1492_s3 = inlined_call_operand.vmem [shape: f32[8,32], index: 3, kind: input, shape index: {}]   ;;  %s1493_s4 = inlined_call_operand.vmem [shape: f32[1,128], index: 4, kind: input, shape index: {}]   ;;  %s1494_s5 = inlined_call_operand.hbm [shape: f32[16,32], index: 5, kind: output, shape index: {}]  }
   0x1   :  { %v21_v0 = vld [vmem:[%s1489_s0] sm:$0xff]  ;;  %v55_v1 = vld [vmem:[%s1491_s2 + $0x38] sm:$0xff]  ;;  %966 = vset.pattern.permute.xlu0 %v1036_v2  ;;  %v54_v3 = vld [vmem:[%s1491_s2 + $0x30] sm:$0xff] }
   0x2   :  { %71 = vmatpush.msra.mxu0 %v55_v1  ;;  %33 = vperm.xlu0 %966, %v21_v0   ;;  %v53_v4 = vld [vmem:[%s1491_s2 + $0x28] sm:$0xff] }
   0x4   :  { %72 = vmatpush.msra.mxu0 %v54_v3 }
   0x5   :  { %10 = vsyncpa [#allocation3], 0  ;;  %v52_v5 = vld [vmem:[%s1491_s2 + $0x20] sm:$0xff]  ;;  %v51_v6 = vld [vmem:[%s1491_s2 + $0x18] sm:$0xff]  ;;  %v23_v19 = vlaneseq  ;;  %vm56_vm2 = vcmask 523264   ;;  %v1037_v28 = vmov 0.0  }
   0x6   :  { %73 = vmatpush.msra.mxu0 %v53_v4  ;;  %v22_v7 = vld [vmem:[%s1489_s0 + $0x8] sm:$0xff]  ;;  %v50_v8 = vld [vmem:[%s1491_s2 + $0x10] sm:$0xff]  ;;  %v48_v10 = vld [vmem:[%s1491_s2] sm:$0xff]  ;;  %vm90_vm7 = vcmask 261120   ;;  %s892_s9 = sshll.u32 %s1494_s5, 4  ;;  %s1040_s10 = smov 128   ;;  %s893_s9 = int_to_ptr.hbm [resolvable:$true] %s892_s9 }
   0x7   :  { %v49_v9 = vld [vmem:[%s1491_s2 + $0x8] sm:$0xff]  ;;  %v89_v11 = vld [vmem:[%s1491_s2 + $0x58] sm:$0xff]  ;;  %v88_v14 = vld [vmem:[%s1491_s2 + $0x50] sm:$0xff]  ;;  %v1129_v21 = vshrl.u32 %v23_v19, 7  ;;  %v24_v23 = vand.u32 127, %v23_v19  ;;  %s1041_s11 = smov 8  }
   0x8   :  { %74 = vmatpush.msra.mxu0 %v52_v5  ;;  %v123_v12 = vld [vmem:[%s1491_s2 + $0x78] sm:$0xff]  ;;  %109 = vmatpush.msra.mxu1 %v89_v11  ;;  %v122_v15 = vld [vmem:[%s1491_s2 + $0x70] sm:$0xff]  ;;  %v87_v17 = vld [vmem:[%s1491_s2 + $0x48] sm:$0xff] }
   0x9   :  { %v150_v13 = vld [vmem:[%s1491_s2 + $0x98] sm:$0xff]  ;;  %136 = vmatpush.msra.mxu2 %v123_v12  ;;  %v149_v16 = vld [vmem:[%s1491_s2 + $0x90] sm:$0xff]  ;;  %v121_v18 = vld [vmem:[%s1491_s2 + $0x68] sm:$0xff]  ;;  %v28_v22 = vand.u32 7, %v1129_v21  ;;  %v1133_v25 = vadd.s32 8, %v1129_v21  ;;  %v1163_v40 = vshra.s32 %v24_v23, 3 }
   0xa   :  { %75 = vmatpush.msra.mxu0 %v51_v6  ;;  %36 = vperm.xlu0 %966, %v22_v7   ;;  %v148_v20 = vld [vmem:[%s1491_s2 + $0x88] sm:$0xff]  ;;  %v86_v33 = vld [vmem:[%s1491_s2 + $0x40] sm:$0xff]  ;;  %v180_v41 = vshra.s32 %v1129_v21, 4  ;;  %v174_v48 = vadd.s32 16, %v1129_v21  ;;  %v175_v53 = vadd.s32 24, %v1129_v21  ;;  %v176_v57 = vadd.s32 32, %v1129_v21 }
   0xb   :  { %163 = vmatpush.msra.mxu3 %v150_v13  ;;  %110 = vmatpush.msra.mxu1 %v88_v14  ;;  %v30_v24 = vadd.s32 50, %v28_v22  ;;  %v29_v26 = vand.u32 7, %v1133_v25  ;;  %v120_v34 = vld [vmem:[%s1491_s2 + $0x60] sm:$0xff]  ;;  %v181_v46 = vshra.s32 %v1133_v25, 4  ;;  %v1198_v61 = vadd.s32 40, %v1129_v21 }
   0xc   :  { %76 = vmatpush.msra.mxu0 %v50_v8  ;;  %137 = vmatpush.msra.mxu2 %v122_v15  ;;  %v147_v35 = vld [vmem:[%s1491_s2 + $0x80] sm:$0xff]  ;;  %vm189_vm8 = vcmp.eq.s32.totalorder %v180_v41, %v1163_v40  ;;  %v182_v51 = vshra.s32 %v174_v48, 4  ;;  %v183_v55 = vshra.s32 %v175_v53, 4  ;;  %v184_v59 = vshra.s32 %v176_v57, 4 }
   0xd   :  { %164 = vmatpush.msra.mxu3 %v149_v16  ;;  %111 = vmatpush.msra.mxu1 %v87_v17  ;;  %vm40_vm0 = vcmp.eq.s32.totalorder %v24_v23, %v30_v24  ;;  %v31_v30 = vadd.s32 50, %v29_v26  ;;  %v1169_v45 = vsel %vm189_vm8, 1.0, %v1037_v28  ;;  %vm190_vm9 = vcmp.eq.s32.totalorder %v181_v46, %v1163_v40  ;;  %v245_v11 = vld [vmem:[%s1490_s1] sm:$0x1] }
   0xe   :  { %77 = vmatpush.msra.mxu0 %v49_v9  ;;  %138 = vmatpush.msra.mxu2 %v121_v18  ;;  %v1178_v50 = vsel %vm190_vm9, 1.0, %v1037_v28  ;;  %vm191_vm10 = vcmp.eq.s32.totalorder %v182_v51, %v1163_v40  ;;  %vm192_vm11 = vcmp.eq.s32.totalorder %v183_v55, %v1163_v40  ;;  %vm193_vm12 = vcmp.eq.s32.totalorder %v184_v59, %v1163_v40 }
   0xf   :  { %165 = vmatpush.msra.mxu3 %v148_v20  ;;  %vm41_vm4 = vcmp.eq.s32.totalorder %v24_v23, %v31_v30  ;;  %112 = vmatpush.msra.mxu1 %v86_v33  ;;  %v1185_v54 = vsel %vm191_vm10, 1.0, %v1037_v28  ;;  %v1192_v58 = vsel %vm192_vm11, 1.0, %v1037_v28  ;;  %v1201_v62 = vsel %vm193_vm12, 1.0, %v1037_v28 }
  0x10   :  { %78 = vmatpush.msra.mxu0 %v48_v10  ;;  %139 = vmatpush.msra.mxu2 %v120_v34  ;;  %v185_v63 = vshra.s32 %v1198_v61, 4  ;;  %v1208_v1 = vadd.s32 48, %v1129_v21  ;;  %v1218_v5 = vadd.s32 56, %v1129_v21  ;;  %v221_v12 = vand.u32 15, %v1129_v21 }
  0x11   :  { %166 = vmatpush.msra.mxu3 %v147_v35  ;;  %v222_v16 = vand.u32 15, %v1133_v25  ;;  %v224_v25 = vand.u32 15, %v175_v53  ;;  %v225_v34 = vand.u32 15, %v176_v57 }
  0x12   :  { %vm194_vm13 = vcmp.eq.s32.totalorder %v185_v63, %v1163_v40  ;;  %v186_v3 = vshra.s32 %v1208_v1, 4  ;;  %v187_v7 = vshra.s32 %v1218_v5, 4  ;;  %v229_v13 = vshra.s32 %v221_v12, 3 }
  0x13   :  { %v1211_v2 = vsel %vm194_vm13, 1.0, %v1037_v28  ;;  %v230_v18 = vshra.s32 %v222_v16, 3  ;;  %v232_v30 = vshra.s32 %v224_v25, 3  ;;  %v227_v51 = vand.u32 15, %v1208_v1 }
  0x14   :  { %vm195_vm14 = vcmp.eq.s32.totalorder %v186_v3, %v1163_v40  ;;  %vm196_vm15 = vcmp.eq.s32.totalorder %v187_v7, %v1163_v40  ;;  %v228_v59 = vand.u32 15, %v1218_v5 }
  0x15   :  { %v1221_v6 = vsel %vm195_vm14, 1.0, %v1037_v28  ;;  %v1228_v9 = vsel %vm196_vm15, 1.0, %v1037_v28  ;;  %v235_v53 = vshra.s32 %v227_v51, 3 }
  0x17   :  { %vm243_vm9 = vcmp.eq.s32.totalorder %v235_v53, %v1163_v40 }
  0x74   :  { %v34_v27 = vpop.permute.xlu0 %33 }
  0x75   :  { %vm38_vm1 = vcmp.eq.s32.totalorder %v24_v23, %v34_v27 }
  0x76   :  { %vm42_vm3 = vmor %vm38_vm1, %vm40_vm0  ;;  %vm246_vm0 = vcmp.eq.f32.partialorder %v245_v11, 0.0  ;;  %vm237_vm1 = vcmp.eq.s32.totalorder %v229_v13, %v1163_v40 }
  0x77   :  { %v904_v29 = vsel %vm42_vm3, 1.0, %v1037_v28  ;;  %v247_v14 = vsel %vm246_vm0, -1.767767e+19, %v1037_v28  ;;  %vm238_vm3 = vcmp.eq.s32.totalorder %v230_v18, %v1163_v40 }
  0x78   :  { %906 = vmatmul.msk.f32.vlgmr.msra.gmra.mxu0 %vm56_vm2, %v904_v29  ;;  %v249_v15 = vperm.slane %v247_v14, 0 }
  0x7a   :  { %v251_v17 = vsel %vm237_vm1, %v249_v15, -3.535534e+19  ;;  %v252_v21 = vsel %vm238_vm3, %v249_v15, -3.535534e+19 }
  0x7c   :  { %v37_v31 = vpop.permute.xlu0 %36 }
  0x7d   :  { %vm39_vm5 = vcmp.eq.s32.totalorder %v24_v23, %v37_v31  ;;  %v223_v23 = vand.u32 15, %v174_v48 }
  0x7e   :  { %vm43_vm6 = vmor %vm39_vm5, %vm41_vm4  ;;  %vm240_vm5 = vcmp.eq.s32.totalorder %v232_v30, %v1163_v40 }
  0x7f   :  { %v905_v32 = vsel %vm43_vm6, 1.0, %v1037_v28  ;;  %v231_v24 = vshra.s32 %v223_v23, 3  ;;  %v254_v35 = vsel %vm240_vm5, %v249_v15, -3.535534e+19 }
  0x80   :  { %907 = vmatmul.msk.f32.gmra.mxu0 %vm56_vm2, %v905_v32  ;;  %vm330_vm2 = vcmask 130048  }
  0x81   :  { %vm239_vm4 = vcmp.eq.s32.totalorder %v231_v24, %v1163_v40 }
  0x82   :  { %v253_v29 = vsel %vm239_vm4, %v249_v15, -3.535534e+19 }
  0xf5   :  { %v1147_v36 = vpop.f32.mrf.mxu0 }
  0xf6   :  { %908 = vmatmul.msk.f32.vlgmr.msra.gmra.mxu1 %vm90_vm7, %v1147_v36  ;;  %910 = vmatmul.msk.f32.vlgmr.msra.gmra.mxu2 %vm90_vm7, %v1147_v36 }
  0xf7   :  { %912 = vmatmul.msk.f32.vlgmr.msra.gmra.mxu3 %vm90_vm7, %v1147_v36 }
  0xfd   :  { %v1155_v37 = vpop.f32.mrf.mxu0 }
  0xfe   :  { %909 = vmatmul.msk.f32.gmra.mxu1 %vm90_vm7, %v1155_v37  ;;  %911 = vmatmul.msk.f32.gmra.mxu2 %vm90_vm7, %v1155_v37 }
  0xff   :  { %913 = vmatmul.msk.f32.gmra.mxu3 %vm90_vm7, %v1155_v37 }
 0x173   :  { %v114_v43 = vpop.f32.mrf.mxu1 }
 0x174   :  { %v213_v47 = vmul.f32 %v1169_v45, %v114_v43  ;;  %v215_v56 = vmul.f32 %v1185_v54, %v114_v43  ;;  %v217_v0 = vmul.f32 %v1201_v62, %v114_v43  ;;  %v219_v8 = vmul.f32 %v1221_v6, %v114_v43 }
 0x175   :  { %v226_v43 = vand.u32 15, %v1198_v61  ;;  %v236_v61 = vshra.s32 %v228_v59, 3 }
 0x177   :  { %v234_v46 = vshra.s32 %v226_v43, 3  ;;  %vm244_vm10 = vcmp.eq.s32.totalorder %v236_v61, %v1163_v40 }
 0x178   :  { %v258_v1 = vsel %vm244_vm10, %v249_v15, -3.535534e+19 }
 0x179   :  { %v141_v38 = vpop.f32.mrf.mxu2  ;;  %vm242_vm8 = vcmp.eq.s32.totalorder %v234_v46, %v1163_v40 }
 0x17a   :  { %v168_v39 = vpop.f32.mrf.mxu3 }
 0x17b   :  { %v117_v49 = vpop.f32.mrf.mxu1 }
 0x17c   :  { %v214_v52 = vmul.f32 %v1178_v50, %v117_v49  ;;  %v216_v60 = vmul.f32 %v1192_v58, %v117_v49  ;;  %v218_v4 = vmul.f32 %v1211_v2, %v117_v49  ;;  %v220_v10 = vmul.f32 %v1228_v9, %v117_v49 }
 0x181   :  { %v144_v42 = vpop.f32.mrf.mxu2 }
 0x182   :  { %v171_v44 = vpop.f32.mrf.mxu3  ;;  %922 = vmatpush.xpose.msk.msrb.mxu1 %vm90_vm7, %v144_v42 }
 0x183   :  { %561 = vmatpush.msrb.mxu2 %v171_v44 }
 0x185   :  { %562 = vmatpush.msrb.mxu2 %v168_v39 }
 0x186   :  { %923 = vmatpush.xpose.msk.msrb.mxu1 %vm90_vm7, %v141_v38  ;;  %v233_v38 = vshra.s32 %v225_v34, 3 }
 0x188   :  { %vm241_vm6 = vcmp.eq.s32.totalorder %v233_v38, %v1163_v40 }
 0x189   :  { %924 = vmatmul.msk.f32.vlgmr.msrb.gmra.mxu1 %vm90_vm7, %v213_v47  ;;  %v255_v44 = vsel %vm241_vm6, %v249_v15, -3.535534e+19 }
 0x191   :  { %925 = vmatmul.msk.f32.gmra.mxu1 %vm90_vm7, %v214_v52  ;;  %v256_v52 = vsel %vm242_vm8, %v249_v15, -3.535534e+19 }
 0x199   :  { %926 = vmatmul.msk.f32.gmra.mxu1 %vm90_vm7, %v215_v56 }
 0x1a1   :  { %927 = vmatmul.msk.f32.gmra.mxu1 %vm90_vm7, %v216_v60  ;;  %v257_v60 = vsel %vm243_vm9, %v249_v15, -3.535534e+19 }
 0x1a9   :  { %928 = vmatmul.msk.f32.gmra.mxu1 %vm90_vm7, %v217_v0 }
 0x1b1   :  { %929 = vmatmul.msk.f32.gmra.mxu1 %vm90_vm7, %v218_v4 }
 0x1b9   :  { %930 = vmatmul.msk.f32.gmra.mxu1 %vm90_vm7, %v219_v8 }
 0x1c1   :  { %931 = vmatmul.msk.f32.gmra.mxu1 %vm90_vm7, %v220_v10 }
 0x206   :  { %v306_v19 = vpop.f32.mrf.mxu1 }
 0x207   :  { %v307_v20 = vadd.f32 %v306_v19, %v251_v17 }
 0x209   :  { %v331_v22 = vsel %vm330_vm2, %v307_v20, -inf }
 0x20a   :  { %332 = vmax.xlane.f32.xlu1 %v331_v22 }
 0x20e   :  { %v309_v26 = vpop.f32.mrf.mxu1 }
 0x20f   :  { %v310_v27 = vadd.f32 %v309_v26, %v252_v21 }
 0x211   :  { %v334_v28 = vsel %vm330_vm2, %v310_v27, -inf }
 0x212   :  { %335 = vmax.xlane.f32.xlu1 %v334_v28 }
 0x216   :  { %v312_v31 = vpop.f32.mrf.mxu1 }
 0x217   :  { %v313_v32 = vadd.f32 %v312_v31, %v253_v29 }
 0x219   :  { %v337_v33 = vsel %vm330_vm2, %v313_v32, -inf }
 0x21a   :  { %338 = vmax.xlane.f32.xlu2 %v337_v33 }
 0x21e   :  { %v315_v39 = vpop.f32.mrf.mxu1 }
 0x21f   :  { %v316_v41 = vadd.f32 %v315_v39, %v254_v35 }
 0x221   :  { %v340_v42 = vsel %vm330_vm2, %v316_v41, -inf }
 0x222   :  { %341 = vmax.xlane.f32.xlu2 %v340_v42 }
 0x226   :  { %v318_v47 = vpop.f32.mrf.mxu1 }
 0x227   :  { %v319_v48 = vadd.f32 %v318_v47, %v255_v44 }
 0x229   :  { %v343_v49 = vsel %vm330_vm2, %v319_v48, -inf }
 0x22a   :  { %344 = vmax.xlane.f32.xlu0 %v343_v49 }
 0x22e   :  { %v321_v55 = vpop.f32.mrf.mxu1 }
 0x22f   :  { %v322_v56 = vadd.f32 %v321_v55, %v256_v52 }
 0x231   :  { %v346_v57 = vsel %vm330_vm2, %v322_v56, -inf }
 0x232   :  { %347 = vmax.xlane.f32.xlu1 %v346_v57 }
 0x236   :  { %v324_v63 = vpop.f32.mrf.mxu1 }
 0x237   :  { %v325_v0 = vadd.f32 %v324_v63, %v257_v60 }
 0x239   :  { %v349_v3 = vsel %vm330_vm2, %v325_v0, -inf }
 0x23a   :  { %350 = vmax.xlane.f32.xlu2 %v349_v3 }
 0x23e   :  { %v327_v4 = vpop.f32.mrf.mxu1 }
 0x23f   :  { %v328_v7 = vadd.f32 %v327_v4, %v258_v1 }
 0x241   :  { %v352_v8 = vsel %vm330_vm2, %v328_v7, -inf }
 0x242   :  { %353 = vmax.xlane.f32.xlu2 %v352_v8 }
 0x27d   :  { %v333_v10 = vpop.xlane.xlu1 %332 }
 0x27e   :  { %v355_v11 = vsub.f32 %v307_v20, %v333_v10 }
 0x280   :  { %v363_v12 = vmul.f32 1.442695, %v355_v11 }
 0x282   :  { %968 = vpow2.f32 %v363_v12 }
 0x285   :  { %v336_v5 = vpop.xlane.xlu1 %335 }
 0x286   :  { %v356_v13 = vsub.f32 %v310_v27, %v336_v5 }
 0x288   :  { %v1257_v14 = vpop.eup %968  ;;  %v365_v16 = vmul.f32 1.442695, %v356_v13 }
 0x289   :  { %v379_v17 = vsel %vm330_vm2, %v1257_v14, 0.0 }
 0x28a   :  { %970 = vpow2.f32 %v365_v16  ;;  %380 = vadd.xlane.f32.xlu1 %v379_v17 }
 0x28d   :  { %v339_v40 = vpop.xlane.xlu2 %338 }
 0x28e   :  { %v357_v15 = vsub.f32 %v313_v32, %v339_v40 }
 0x290   :  { %v1261_v18 = vpop.eup %970  ;;  %v367_v19 = vmul.f32 1.442695, %v357_v15 }
 0x291   :  { %v382_v20 = vsel %vm330_vm2, %v1261_v18, 0.0 }
 0x292   :  { %972 = vpow2.f32 %v367_v19  ;;  %383 = vadd.xlane.f32.xlu1 %v382_v20 }
 0x295   :  { %v342_v22 = vpop.xlane.xlu2 %341 }
 0x296   :  { %v358_v23 = vsub.f32 %v316_v41, %v342_v22 }
 0x298   :  { %v1265_v21 = vpop.eup %972  ;;  %v369_v24 = vmul.f32 1.442695, %v358_v23 }
 0x299   :  { %v385_v26 = vsel %vm330_vm2, %v1265_v21, 0.0 }
 0x29a   :  { %974 = vpow2.f32 %v369_v24  ;;  %386 = vadd.xlane.f32.xlu2 %v385_v26 }
 0x29d   :  { %v345_v27 = vpop.xlane.xlu0 %344 }
 0x29e   :  { %v359_v28 = vsub.f32 %v319_v48, %v345_v27 }
 0x2a0   :  { %v1269_v25 = vpop.eup %974  ;;  %v371_v29 = vmul.f32 1.442695, %v359_v28 }
 0x2a1   :  { %v388_v30 = vsel %vm330_vm2, %v1269_v25, 0.0 }
 0x2a2   :  { %976 = vpow2.f32 %v371_v29  ;;  %389 = vadd.xlane.f32.xlu1 %v388_v30 }
 0x2a5   :  { %v348_v31 = vpop.xlane.xlu1 %347 }
 0x2a6   :  { %v360_v32 = vsub.f32 %v322_v56, %v348_v31 }
 0x2a8   :  { %v1273_v33 = vpop.eup %976  ;;  %v373_v34 = vmul.f32 1.442695, %v360_v32 }
 0x2a9   :  { %v391_v35 = vsel %vm330_vm2, %v1273_v33, 0.0 }
 0x2aa   :  { %978 = vpow2.f32 %v373_v34  ;;  %392 = vadd.xlane.f32.xlu2 %v391_v35 }
 0x2ad   :  { %v351_v38 = vpop.xlane.xlu2 %350 }
 0x2ae   :  { %v361_v39 = vsub.f32 %v325_v0, %v351_v38 }
 0x2b0   :  { %v1277_v41 = vpop.eup %978  ;;  %v375_v42 = vmul.f32 1.442695, %v361_v39 }
 0x2b1   :  { %v394_v43 = vsel %vm330_vm2, %v1277_v41, 0.0 }
 0x2b2   :  { %980 = vpow2.f32 %v375_v42  ;;  %395 = vadd.xlane.f32.xlu1 %v394_v43 }
 0x2b5   :  { %v354_v44 = vpop.xlane.xlu2 %353 }
 0x2b6   :  { %v362_v46 = vsub.f32 %v328_v7, %v354_v44 }
 0x2b8   :  { %v1281_v47 = vpop.eup %980  ;;  %v377_v48 = vmul.f32 1.442695, %v362_v46 }
 0x2b9   :  { %v397_v49 = vsel %vm330_vm2, %v1281_v47, 0.0 }
 0x2ba   :  { %982 = vpow2.f32 %v377_v48  ;;  %398 = vadd.xlane.f32.xlu2 %v397_v49 }
 0x2c0   :  { %v1285_v51 = vpop.eup %982 }
 0x2c1   :  { %v400_v52 = vsel %vm330_vm2, %v1285_v51, 0.0 }
 0x2c2   :  { %401 = vadd.xlane.f32.xlu1 %v400_v52 }
 0x2fd   :  { %v381_v53 = vpop.xlane.xlu1 %380 }
 0x2fe   :  { %984 = vrcp.f32 %v381_v53  ;;  %v414_v60 = vand.u32 2147483648, %v381_v53  ;;  %v412_v63 = vand.u32 2147483647, %v381_v53  ;;  %vm408_vm12 = vweird.f32 %v381_v53 }
 0x300   :  { %v415_v1 = vor.u32 1.1754944e-38, %v414_v60  ;;  %vm413_vm14 = vcmp.eq.f32.partialorder %v412_v63, 8.507059e+37 }
 0x304   :  { %v985_v55 = vpop.eup %984 }
 0x305   :  { %v404_v56 = vmul.f32 %v985_v55, %v381_v53  ;;  %v384_v57 = vpop.xlane.xlu1 %383  ;;  %vm409_vm11 = vweird.f32 %v985_v55 }
 0x306   :  { %986 = vrcp.f32 %v384_v57  ;;  %vm410_vm13 = vmor %vm408_vm12, %vm409_vm11  ;;  %v429_v5 = vand.u32 2147483648, %v384_v57  ;;  %v427_v16 = vand.u32 2147483647, %v384_v57  ;;  %vm423_vm0 = vweird.f32 %v384_v57 }
 0x307   :  { %v405_v59 = vsub.f32 1.0, %v404_v56 }
 0x308   :  { %v430_v15 = vor.u32 1.1754944e-38, %v429_v5  ;;  %vm428_vm3 = vcmp.eq.f32.partialorder %v427_v16, 8.507059e+37 }
 0x309   :  { %v406_v61 = vmul.f32 %v985_v55, %v405_v59 }
 0x30b   :  { %v407_v0 = vadd.f32 %v985_v55, %v406_v61 }
 0x30c   :  { %v987_v3 = vpop.eup %986 }
 0x30d   :  { %v419_v4 = vmul.f32 %v987_v3, %v384_v57  ;;  %v387_v7 = vpop.xlane.xlu2 %386  ;;  %v411_v8 = vsel %vm410_vm13, %v985_v55, %v407_v0  ;;  %vm424_vm15 = vweird.f32 %v987_v3 }
 0x30e   :  { %988 = vrcp.f32 %v387_v7  ;;  %v416_v10 = vsel %vm413_vm14, %v415_v1, %v411_v8  ;;  %vm425_vm1 = vmor %vm423_vm0, %vm424_vm15  ;;  %v444_v26 = vand.u32 2147483648, %v387_v7  ;;  %v442_v28 = vand.u32 2147483647, %v387_v7 }
 0x30f   :  { %v420_v11 = vsub.f32 1.0, %v419_v4  ;;  %v417_v12 = vmul.f32 %v1257_v14, %v416_v10  ;;  %vm438_vm5 = vweird.f32 %v387_v7 }
 0x310   :  { %v445_v31 = vor.u32 1.1754944e-38, %v444_v26  ;;  %vm443_vm8 = vcmp.eq.f32.partialorder %v442_v28, 8.507059e+37 }
 0x311   :  { %v421_v13 = vmul.f32 %v987_v3, %v420_v11  ;;  %932 = vmatmul.msk.f32.vlgmr.msrb.gmra.mxu2 %vm330_vm2, %v417_v12 }
 0x313   :  { %v422_v17 = vadd.f32 %v987_v3, %v421_v13 }
 0x314   :  { %v989_v40 = vpop.eup %988 }
 0x315   :  { %v434_v19 = vmul.f32 %v989_v40, %v387_v7  ;;  %v390_v20 = vpop.xlane.xlu1 %389  ;;  %v426_v22 = vsel %vm425_vm1, %v987_v3, %v422_v17  ;;  %vm439_vm4 = vweird.f32 %v989_v40 }
 0x316   :  { %990 = vrcp.f32 %v390_v20  ;;  %v431_v23 = vsel %vm428_vm3, %v430_v15, %v426_v22  ;;  %vm440_vm6 = vmor %vm438_vm5, %vm439_vm4  ;;  %v459_v42 = vand.u32 2147483648, %v390_v20  ;;  %v457_v44 = vand.u32 2147483647, %v390_v20 }
 0x317   :  { %v435_v24 = vsub.f32 1.0, %v434_v19  ;;  %v432_v14 = vmul.f32 %v1261_v18, %v431_v23  ;;  %vm453_vm10 = vweird.f32 %v390_v20 }
 0x318   :  { %v460_v49 = vor.u32 1.1754944e-38, %v459_v42  ;;  %vm458_vm12 = vcmp.eq.f32.partialorder %v457_v44, 8.507059e+37 }
 0x319   :  { %v436_v27 = vmul.f32 %v989_v40, %v435_v24  ;;  %933 = vmatmul.msk.f32.gmra.mxu2 %vm330_vm2, %v432_v14 }
 0x31b   :  { %v437_v29 = vadd.f32 %v989_v40, %v436_v27 }
 0x31c   :  { %v991_v30 = vpop.eup %990 }
 0x31d   :  { %v449_v32 = vmul.f32 %v991_v30, %v390_v20  ;;  %v393_v34 = vpop.xlane.xlu2 %392  ;;  %v441_v35 = vsel %vm440_vm6, %v989_v40, %v437_v29  ;;  %vm454_vm9 = vweird.f32 %v991_v30 }
 0x31e   :  { %992 = vrcp.f32 %v393_v34  ;;  %v446_v38 = vsel %vm443_vm8, %v445_v31, %v441_v35  ;;  %vm455_vm11 = vmor %vm453_vm10, %vm454_vm9  ;;  %v474_v59 = vand.u32 2147483648, %v393_v34  ;;  %v472_v61 = vand.u32 2147483647, %v393_v34 }
 0x31f   :  { %v450_v39 = vsub.f32 1.0, %v449_v32  ;;  %v447_v18 = vmul.f32 %v1265_v21, %v446_v38  ;;  %vm468_vm14 = vweird.f32 %v393_v34 }
 0x320   :  { %v475_v3 = vor.u32 1.1754944e-38, %v474_v59  ;;  %vm473_vm0 = vcmp.eq.f32.partialorder %v472_v61, 8.507059e+37 }
 0x321   :  { %v451_v43 = vmul.f32 %v991_v30, %v450_v39  ;;  %934 = vmatmul.msk.f32.gmra.mxu2 %vm330_vm2, %v447_v18 }
 0x323   :  { %v452_v46 = vadd.f32 %v991_v30, %v451_v43 }
 0x324   :  { %v993_v48 = vpop.eup %992 }
 0x325   :  { %v464_v52 = vmul.f32 %v993_v48, %v393_v34  ;;  %v396_v53 = vpop.xlane.xlu1 %395  ;;  %v456_v55 = vsel %vm455_vm11, %v991_v30, %v452_v46  ;;  %vm469_vm13 = vweird.f32 %v993_v48 }
 0x326   :  { %994 = vrcp.f32 %v396_v53  ;;  %v461_v56 = vsel %vm458_vm12, %v460_v49, %v456_v55  ;;  %vm470_vm15 = vmor %vm468_vm14, %vm469_vm13  ;;  %v489_v11 = vand.u32 2147483648, %v396_v53  ;;  %v487_v5 = vand.u32 2147483647, %v396_v53 }
 0x327   :  { %v465_v57 = vsub.f32 1.0, %v464_v52  ;;  %v462_v21 = vmul.f32 %v1269_v25, %v461_v56  ;;  %vm483_vm3 = vweird.f32 %v396_v53  ;;  %v604_v52 = vld [vmem:[%s1491_s2 + $0xb0] sm:$0xff] }
 0x328   :  { %v490_v17 = vor.u32 1.1754944e-38, %v489_v11  ;;  %vm488_vm5 = vcmp.eq.f32.partialorder %v487_v5, 8.507059e+37  ;;  %v1038_v5 = vmov 32.0  }
 0x329   :  { %v466_v60 = vmul.f32 %v993_v48, %v465_v57  ;;  %935 = vmatmul.msk.f32.gmra.mxu2 %vm330_vm2, %v462_v21 }
 0x32b   :  { %v467_v63 = vadd.f32 %v993_v48, %v466_v60 }
 0x32c   :  { %v995_v0 = vpop.eup %994 }
 0x32d   :  { %v479_v1 = vmul.f32 %v995_v0, %v396_v53  ;;  %v399_v4 = vpop.xlane.xlu2 %398  ;;  %v471_v7 = vsel %vm470_vm15, %v993_v48, %v467_v63  ;;  %vm484_vm1 = vweird.f32 %v995_v0  ;;  %v603_v53 = vld [vmem:[%s1491_s2 + $0xa8] sm:$0xff] }
 0x32e   :  { %996 = vrcp.f32 %v399_v4  ;;  %v476_v8 = vsel %vm473_vm0, %v475_v3, %v471_v7  ;;  %vm485_vm4 = vmor %vm483_vm3, %vm484_vm1  ;;  %v504_v23 = vand.u32 2147483648, %v399_v4  ;;  %v502_v14 = vand.u32 2147483647, %v399_v4 }
 0x32f   :  { %v480_v10 = vsub.f32 1.0, %v479_v1  ;;  %v477_v25 = vmul.f32 %v1273_v33, %v476_v8  ;;  %vm498_vm8 = vweird.f32 %v399_v4 }
 0x330   :  { %v505_v28 = vor.u32 1.1754944e-38, %v504_v23  ;;  %vm503_vm10 = vcmp.eq.f32.partialorder %v502_v14, 8.507059e+37 }
 0x331   :  { %v481_v12 = vmul.f32 %v995_v0, %v480_v10  ;;  %936 = vmatmul.msk.f32.gmra.mxu2 %vm330_vm2, %v477_v25 }
 0x333   :  { %v482_v13 = vadd.f32 %v995_v0, %v481_v12 }
 0x334   :  { %v997_v16 = vpop.eup %996 }
 0x335   :  { %v494_v40 = vmul.f32 %v997_v16, %v399_v4  ;;  %v402_v15 = vpop.xlane.xlu1 %401  ;;  %v486_v19 = vsel %vm485_vm4, %v995_v0, %v482_v13  ;;  %vm499_vm6 = vweird.f32 %v997_v16 }
 0x336   :  { %998 = vrcp.f32 %v402_v15  ;;  %v491_v20 = vsel %vm488_vm5, %v490_v17, %v486_v19  ;;  %vm500_vm9 = vmor %vm498_vm8, %vm499_vm6  ;;  %v519_v35 = vand.u32 2147483648, %v402_v15  ;;  %v517_v38 = vand.u32 2147483647, %v402_v15  ;;  %v707_v17 = vld [vmem:[%s1491_s2 + $0x130] sm:$0xff]  ;;  %v705_v19 = vld [vmem:[%s1491_s2 + $0x120] sm:$0xff] }
 0x337   :  { %v495_v22 = vsub.f32 1.0, %v494_v40  ;;  %v492_v33 = vmul.f32 %v1277_v41, %v491_v20  ;;  %vm513_vm12 = vweird.f32 %v402_v15  ;;  %1000 = vrcp.f32 %v1038_v5  ;;  %v706_v40 = vld [vmem:[%s1491_s2 + $0x128] sm:$0xff] }
 0x338   :  { %v520_v18 = vor.u32 1.1754944e-38, %v519_v35  ;;  %vm518_vm14 = vcmp.eq.f32.partialorder %v517_v38, 8.507059e+37  ;;  %v700_v35 = vld [vmem:[%s1491_s2 + $0xf8] sm:$0xff]  ;;  %v699_v38 = vld [vmem:[%s1491_s2 + $0xf0] sm:$0xff] }
 0x339   :  { %v496_v24 = vmul.f32 %v997_v16, %v495_v22  ;;  %937 = vmatmul.msk.f32.gmra.mxu2 %vm330_vm2, %v492_v33  ;;  %v704_v22 = vld [vmem:[%s1491_s2 + $0x118] sm:$0xff] }
 0x33b   :  { %v497_v26 = vadd.f32 %v997_v16, %v496_v24  ;;  %v703_v24 = vld [vmem:[%s1491_s2 + $0x110] sm:$0xff] }
 0x33c   :  { %v999_v27 = vpop.eup %998 }
 0x33d   :  { %v509_v29 = vmul.f32 %v999_v27, %v402_v15  ;;  %v501_v30 = vsel %vm500_vm9, %v997_v16, %v497_v26  ;;  %vm514_vm11 = vweird.f32 %v999_v27  ;;  %v1001_v13 = vpop.eup %1000 }
 0x33e   :  { %v506_v31 = vsel %vm503_vm10, %v505_v28, %v501_v30  ;;  %vm515_vm13 = vmor %vm513_vm12, %vm514_vm11  ;;  %v643_v16 = vmul.f32 32.0, %v1001_v13 }
 0x33f   :  { %v510_v32 = vsub.f32 1.0, %v509_v29  ;;  %v507_v34 = vmul.f32 %v1281_v47, %v506_v31  ;;  %v605_v47 = vld [vmem:[%s1491_s2 + $0xb8] sm:$0xff]  ;;  %v701_v31 = vld [vmem:[%s1491_s2 + $0x100] sm:$0xff] }
 0x340   :  { %625 = vmatpush.msrb.mxu3 %v605_v47 }
 0x341   :  { %v511_v41 = vmul.f32 %v999_v27, %v510_v32  ;;  %938 = vmatmul.msk.f32.gmra.mxu2 %vm330_vm2, %v507_v34 }
 0x342   :  { %626 = vmatpush.msrb.mxu3 %v604_v52  ;;  %v807_v52 = vld [vmem:[%s1491_s2 + $0x1b8] sm:$0xff] }
 0x343   :  { %v512_v39 = vadd.f32 %v999_v27, %v511_v41 }
 0x344   :  { %627 = vmatpush.msrb.mxu3 %v603_v53  ;;  %v806_v53 = vld [vmem:[%s1491_s2 + $0x1b0] sm:$0xff] }
 0x345   :  { %v516_v42 = vsel %vm515_vm13, %v999_v27, %v512_v39  ;;  %v702_v27 = vld [vmem:[%s1491_s2 + $0x108] sm:$0xff] }
 0x346   :  { %v521_v43 = vsel %vm518_vm14, %v520_v18, %v516_v42  ;;  %v698_v39 = vld [vmem:[%s1491_s2 + $0xe8] sm:$0xff]  ;;  %v697_v18 = vld [vmem:[%s1491_s2 + $0xe0] sm:$0xff]  ;;  %v696_v42 = vld [vmem:[%s1491_s2 + $0xd8] sm:$0xff] }
 0x347   :  { %v522_v44 = vmul.f32 %v1285_v51, %v521_v43  ;;  %v602_v51 = vld [vmem:[%s1491_s2 + $0xa0] sm:$0xff]  ;;  %v695_v43 = vld [vmem:[%s1491_s2 + $0xd0] sm:$0xff] }
 0x348   :  { %628 = vmatpush.msrb.mxu3 %v602_v51  ;;  %v805_v51 = vld [vmem:[%s1491_s2 + $0x1a8] sm:$0xff] }
 0x349   :  { %939 = vmatmul.msk.f32.gmra.mxu2 %vm330_vm2, %v522_v44  ;;  %vm647_vm2 = vweird.f32 %v1001_v13  ;;  %v694_v44 = vld [vmem:[%s1491_s2 + $0xc8] sm:$0xff] }
 0x34a   :  { %809 = vmatpush.msra.mxu3 %v807_v52 }
 0x34c   :  { %810 = vmatpush.msra.mxu3 %v806_v53 }
 0x34e   :  { %811 = vmatpush.msra.mxu3 %v805_v51 }
 0x394   :  { %v564_v46 = vpop.f32.mrf.mxu2 }
 0x395   :  { %v588_v59 = vmul.f32 %v1169_v45, %v564_v46  ;;  %v693_v46 = vld [vmem:[%s1491_s2 + $0xc0] sm:$0xff] }
 0x39c   :  { %v567_v48 = vpop.f32.mrf.mxu2 }
 0x39d   :  { %v589_v7 = vmul.f32 %v1178_v50, %v567_v48 }
 0x3a4   :  { %v570_v49 = vpop.f32.mrf.mxu2 }
 0x3a5   :  { %v590_v21 = vmul.f32 %v1185_v54, %v570_v49 }
 0x3a7   :  { %v596_v61 = vadd.f32 %v590_v21, %v588_v59 }
 0x3ac   :  { %v573_v55 = vpop.f32.mrf.mxu2 }
 0x3ad   :  { %v591_v1 = vmul.f32 %v1192_v58, %v573_v55 }
 0x3af   :  { %v597_v10 = vadd.f32 %v591_v1, %v589_v7 }
 0x3b4   :  { %v576_v56 = vpop.f32.mrf.mxu2 }
 0x3b5   :  { %v592_v60 = vmul.f32 %v1201_v62, %v576_v56 }
 0x3b7   :  { %v598_v0 = vadd.f32 %v596_v61, %v592_v60  ;;  %v803_v60 = vld [vmem:[%s1491_s2 + $0x198] sm:$0xff] }
 0x3bc   :  { %v579_v57 = vpop.f32.mrf.mxu2 }
 0x3bd   :  { %v593_v8 = vmul.f32 %v1211_v2, %v579_v57  ;;  %v804_v57 = vld [vmem:[%s1491_s2 + $0x1a0] sm:$0xff] }
 0x3be   :  { %812 = vmatpush.msra.mxu3 %v804_v57 }
 0x3bf   :  { %v599_v25 = vadd.f32 %v597_v10, %v593_v8  ;;  %v1438_v8 = vld [vmem:[%s1492_s3] sm:$0xff] }
 0x3c0   :  { %813 = vmatpush.msra.mxu3 %v803_v60 }
 0x3c4   :  { %v582_v63 = vpop.f32.mrf.mxu2 }
 0x3c5   :  { %v594_v3 = vmul.f32 %v1221_v6, %v582_v63  ;;  %v802_v63 = vld [vmem:[%s1491_s2 + $0x190] sm:$0xff] }
 0x3c6   :  { %814 = vmatpush.msra.mxu3 %v802_v63 }
 0x3c7   :  { %v600_v4 = vadd.f32 %v598_v0, %v594_v3  ;;  %v801_v3 = vld [vmem:[%s1491_s2 + $0x188] sm:$0xff] }
 0x3c8   :  { %815 = vmatpush.msra.mxu3 %v801_v3 }
 0x3c9   :  { %940 = vmatmul.msk.f32.vlgmr.msrb.gmra.mxu3 %vm90_vm7, %v600_v4  ;;  %v800_v4 = vld [vmem:[%s1491_s2 + $0x180] sm:$0xff] }
 0x3ca   :  { %816 = vmatpush.msra.mxu3 %v800_v4 }
 0x3cc   :  { %v585_v54 = vpop.f32.mrf.mxu2 }
 0x3cd   :  { %v595_v45 = vmul.f32 %v1228_v9, %v585_v54  ;;  %v708_v9 = vld [vmem:[%s1491_s2 + $0x138] sm:$0xff] }
 0x3ce   :  { %942 = vmatpush.xpose.msk.msrb.mxu0 %vm90_vm7, %v708_v9  ;;  %v799_v54 = vld [vmem:[%s1491_s2 + $0x178] sm:$0xff] }
 0x3cf   :  { %v601_v62 = vadd.f32 %v599_v25, %v595_v45  ;;  %817 = vmatpush.msra.mxu3 %v799_v54 }
 0x3d1   :  { %941 = vmatmul.msk.f32.gmra.mxu3 %vm90_vm7, %v601_v62  ;;  %v687_v62 = vperm.slane %v1438_v8, 0 }
 0x3d2   :  { %943 = vmatpush.xpose.msk.msrb.mxu0 %vm90_vm7, %v707_v17  ;;  %v795_v17 = vld [vmem:[%s1491_s2 + $0x158] sm:$0xff] }
 0x3d6   :  { %944 = vmatpush.xpose.msk.msrb.mxu0 %vm90_vm7, %v706_v40 }
 0x3da   :  { %945 = vmatpush.xpose.msk.msrb.mxu0 %vm90_vm7, %v705_v19 }
 0x3de   :  { %946 = vmatpush.xpose.msk.msrb.mxu0 %vm90_vm7, %v704_v22 }
 0x3e2   :  { %947 = vmatpush.xpose.msk.msrb.mxu0 %vm90_vm7, %v703_v24  ;;  %v792_v24 = vld [vmem:[%s1491_s2 + $0x140] sm:$0xff] }
 0x3e6   :  { %948 = vmatpush.xpose.msk.msrb.mxu0 %vm90_vm7, %v702_v27 }
 0x3ea   :  { %949 = vmatpush.xpose.msk.msrb.mxu0 %vm90_vm7, %v701_v31 }
 0x3ee   :  { %950 = vmatpush.xpose.msk.msrb.mxu0 %vm90_vm7, %v700_v35 }
 0x3f2   :  { %951 = vmatpush.xpose.msk.msrb.mxu0 %vm90_vm7, %v699_v38 }
 0x3f6   :  { %952 = vmatpush.xpose.msk.msrb.mxu0 %vm90_vm7, %v698_v39 }
 0x3fa   :  { %953 = vmatpush.xpose.msk.msrb.mxu0 %vm90_vm7, %v697_v18 }
 0x3fe   :  { %954 = vmatpush.xpose.msk.msrb.mxu0 %vm90_vm7, %v696_v42 }
 0x402   :  { %955 = vmatpush.xpose.msk.msrb.mxu0 %vm90_vm7, %v695_v43 }
 0x406   :  { %956 = vmatpush.xpose.msk.msrb.mxu0 %vm90_vm7, %v694_v44 }
 0x40a   :  { %957 = vmatpush.xpose.msk.msrb.mxu0 %vm90_vm7, %v693_v46 }
 0x44c   :  { %v630_v11 = vpop.f32.mrf.mxu3 }
 0x44d   :  { %v631_v6 = vadd.f32 %v630_v11, %v1147_v36  ;;  %v644_v36 = vsub.f32 1.0, %v643_v16  ;;  %v798_v11 = vld [vmem:[%s1491_s2 + $0x170] sm:$0xff]  ;;  %v796_v16 = vld [vmem:[%s1491_s2 + $0x160] sm:$0xff] }
 0x44e   :  { %818 = vmatpush.msra.mxu3 %v798_v11 }
 0x44f   :  { %v636_v58 = vsel %vm90_vm7, %v631_v6, 0.0 }
 0x450   :  { %637 = vadd.xlane.f32.xlu2 %v636_v58 }
 0x454   :  { %v633_v12 = vpop.f32.mrf.mxu3 }
 0x455   :  { %v634_v50 = vadd.f32 %v633_v12, %v1155_v37  ;;  %v645_v37 = vmul.f32 %v1001_v13, %v644_v36 }
 0x457   :  { %v639_v2 = vsel %vm90_vm7, %v634_v50, 0.0  ;;  %v646_v15 = vadd.f32 %v1001_v13, %v645_v37 }
 0x458   :  { %640 = vadd.xlane.f32.xlu0 %v639_v2  ;;  %v797_v2 = vld [vmem:[%s1491_s2 + $0x168] sm:$0xff] }
 0x459   :  { %v1347_v20 = vsel %vm647_vm2, %v1001_v13, %v646_v15  ;;  %819 = vmatpush.msra.mxu3 %v797_v2 }
 0x45b   :  { %820 = vmatpush.msra.mxu3 %v796_v16 }
 0x45d   :  { %821 = vmatpush.msra.mxu3 %v795_v17 }
 0x4c3   :  { %v638_v33 = vpop.xlane.xlu2 %637 }
 0x4c4   :  { %v649_v23 = vmul.f32 %v1347_v20, %v638_v33  ;;  %v794_v33 = vld [vmem:[%s1491_s2 + $0x150] sm:$0xff] }
 0x4c5   :  { %822 = vmatpush.msra.mxu3 %v794_v33 }
 0x4c6   :  { %v1357_v14 = vsub.f32 %v631_v6, %v649_v23  ;;  %v793_v23 = vld [vmem:[%s1491_s2 + $0x148] sm:$0xff]  ;;  %s1039_s2 = smov [#allocation2]  }
 0x4c7   :  { %823 = vmatpush.msra.mxu3 %v793_v23 }
 0x4c8   :  { %v653_v26 = vmul.f32 %v1357_v14, %v1357_v14 }
 0x4c9   :  { %824 = vmatpush.msra.mxu3 %v792_v24 }
 0x4ca   :  { %v655_v28 = vsel %vm90_vm7, %v653_v26, 0.0 }
 0x4cb   :  { %656 = vadd.xlane.f32.xlu1 %v655_v28  ;;  %v641_v29 = vpop.xlane.xlu0 %640 }
 0x4cc   :  { %v650_v30 = vmul.f32 %v1347_v20, %v641_v29 }
 0x4ce   :  { %v1371_v32 = vsub.f32 %v634_v50, %v650_v30  ;;  %v690_v50 = vperm.slane %v1438_v8, 1 }
 0x4d0   :  { %v654_v34 = vmul.f32 %v1371_v32, %v1371_v32 }
 0x4d2   :  { %v658_v41 = vsel %vm90_vm7, %v654_v34, 0.0 }
 0x4d3   :  { %659 = vadd.xlane.f32.xlu2 %v658_v41 }
 0x53e   :  { %v657_v48 = vpop.xlane.xlu1 %656 }
 0x53f   :  { %v661_v47 = vmul.f32 %v657_v48, %v1347_v20 }
 0x541   :  { %v663_v49 = vadd.f32 1e-05, %v661_v47 }
 0x543   :  { %1002 = vrsqrt.f32 %v663_v49  ;;  %vm671_vm0 = vweird.f32 %v663_v49 }
 0x546   :  { %v660_v55 = vpop.xlane.xlu2 %659 }
 0x547   :  { %v662_v56 = vmul.f32 %v660_v55, %v1347_v20 }
 0x549   :  { %v1003_v21 = vpop.eup %1002  ;;  %v664_v59 = vadd.f32 1e-05, %v662_v56 }
 0x54a   :  { %v666_v61 = vmul.f32 %v1003_v21, %v663_v49  ;;  %vm672_vm15 = vweird.f32 %v1003_v21 }
 0x54b   :  { %1004 = vrsqrt.f32 %v664_v59  ;;  %vm673_vm1 = vmor %vm671_vm0, %vm672_vm15  ;;  %vm681_vm4 = vweird.f32 %v664_v59 }
 0x54c   :  { %v667_v0 = vmul.f32 %v1003_v21, %v666_v61 }
 0x54e   :  { %v668_v1 = vmul.f32 0.5, %v667_v0 }
 0x550   :  { %v669_v7 = vsub.f32 1.5, %v668_v1 }
 0x551   :  { %v1005_v10 = vpop.eup %1004 }
 0x552   :  { %v670_v25 = vmul.f32 %v1003_v21, %v669_v7  ;;  %v676_v45 = vmul.f32 %v1005_v10, %v664_v59  ;;  %vm682_vm3 = vweird.f32 %v1005_v10 }
 0x553   :  { %vm683_vm5 = vmor %vm681_vm4, %vm682_vm3 }
 0x554   :  { %v674_v6 = vsel %vm673_vm1, %v1003_v21, %v670_v25  ;;  %v677_v58 = vmul.f32 %v1005_v10, %v676_v45  ;;  %v878_v45 = vperm.slane %v1438_v8, 2 }
 0x555   :  { %v685_v12 = vmul.f32 %v674_v6, %v1357_v14  ;;  %v967_v14 = vld [vmem:[%s1493_s4] ss:$0 sm:$0xff]  ;;  %s890_s4 = sshll.u32 %s1039_s2, 4  ;;  %s891_s4 = int_to_ptr.vmem [resolvable:$true] %s890_s4 }
 0x556   :  { %v678_v5 = vmul.f32 0.5, %v677_v58 }
 0x557   :  { %v688_v13 = vmul.f32 %v687_v62, %v685_v12 }
 0x558   :  { %v679_v9 = vsub.f32 1.5, %v678_v5 }
 0x559   :  { %v691_v36 = vadd.f32 %v690_v50, %v688_v13 }
 0x55a   :  { %v680_v37 = vmul.f32 %v1005_v10, %v679_v9 }
 0x55b   :  { %958 = vmatmul.msk.f32.vlgmr.msrb.gmra.mxu0 %vm90_vm7, %v691_v36 }
 0x55c   :  { %v684_v40 = vsel %vm683_vm5, %v1005_v10, %v680_v37 }
 0x55d   :  { %v686_v15 = vmul.f32 %v684_v40, %v1371_v32  ;;  %v808_v32 = vperm.slane %v1438_v8, 4 }
 0x55f   :  { %v689_v19 = vmul.f32 %v687_v62, %v686_v15 }
 0x561   :  { %v692_v22 = vadd.f32 %v690_v50, %v689_v19 }
 0x563   :  { %959 = vmatmul.msk.f32.gmra.mxu0 %vm90_vm7, %v692_v22 }
 0x5d8   :  { %v784_v26 = vpop.f32.mrf.mxu0 }
 0x5d9   :  { %v785_v27 = vadd.f32 %v967_v14, %v784_v26 }
 0x5db   :  { %v790_v28 = vmax.f32 %v785_v27, 0.0 }
 0x5dd   :  { %825 = vmatmul.f32.vlgmr.msra.gmra.mxu3 %v790_v28 }
 0x5e0   :  { %v787_v29 = vpop.f32.mrf.mxu0 }
 0x5e1   :  { %v788_v30 = vadd.f32 %v967_v14, %v787_v29 }
 0x5e3   :  { %v791_v31 = vmax.f32 %v788_v30, 0.0 }
 0x5e5   :  { %828 = vmatmul.f32.gmra.mxu3 %v791_v31 }
 0x660   :  { %v826_v34 = vpop.f32.mrf.mxu3 }
 0x661   :  { %v827_v35 = vadd.f32 %v826_v34, %v808_v32 }
 0x663   :  { %v832_v41 = vadd.f32 %v827_v35, %v691_v36 }
 0x665   :  { %v834_v38 = vsel %vm90_vm7, %v832_v41, 0.0 }
 0x666   :  { %835 = vadd.xlane.f32.xlu0 %v834_v38 }
 0x668   :  { %v829_v39 = vpop.f32.mrf.mxu3 }
 0x669   :  { %v830_v18 = vadd.f32 %v829_v39, %v808_v32 }
 0x66b   :  { %v833_v42 = vadd.f32 %v830_v18, %v692_v22 }
 0x66d   :  { %v837_v43 = vsel %vm90_vm7, %v833_v42, 0.0 }
 0x66e   :  { %838 = vadd.xlane.f32.xlu1 %v837_v43 }
 0x6d9   :  { %v836_v44 = vpop.xlane.xlu0 %835 }
 0x6da   :  { %v840_v46 = vmul.f32 %v836_v44, %v1347_v20 }
 0x6dc   :  { %v842_v48 = vsub.f32 %v832_v41, %v840_v46 }
 0x6de   :  { %v844_v47 = vmul.f32 %v842_v48, %v842_v48 }
 0x6e0   :  { %v846_v49 = vsel %vm90_vm7, %v844_v47, 0.0 }
 0x6e1   :  { %v839_v52 = vpop.xlane.xlu1 %838  ;;  %847 = vadd.xlane.f32.xlu2 %v846_v49 }
 0x6e2   :  { %v841_v53 = vmul.f32 %v839_v52, %v1347_v20 }
 0x6e4   :  { %v843_v51 = vsub.f32 %v833_v42, %v841_v53 }
 0x6e6   :  { %v845_v55 = vmul.f32 %v843_v51, %v843_v51 }
 0x6e8   :  { %v849_v56 = vsel %vm90_vm7, %v845_v55, 0.0 }
 0x6e9   :  { %850 = vadd.xlane.f32.xlu0 %v849_v56 }
 0x754   :  { %v848_v57 = vpop.xlane.xlu2 %847 }
 0x755   :  { %v852_v21 = vmul.f32 %v848_v57, %v1347_v20 }
 0x757   :  { %v854_v59 = vadd.f32 1e-05, %v852_v21 }
 0x759   :  { %1006 = vrsqrt.f32 %v854_v59  ;;  %vm862_vm8 = vweird.f32 %v854_v59 }
 0x75c   :  { %v851_v60 = vpop.xlane.xlu0 %850 }
 0x75d   :  { %v853_v61 = vmul.f32 %v851_v60, %v1347_v20  ;;  %v881_v20 = vperm.slane %v1438_v8, 3 }
 0x75f   :  { %v1007_v63 = vpop.eup %1006  ;;  %v855_v0 = vadd.f32 1e-05, %v853_v61 }
 0x760   :  { %v857_v3 = vmul.f32 %v1007_v63, %v854_v59  ;;  %vm863_vm6 = vweird.f32 %v1007_v63 }
 0x761   :  { %1008 = vrsqrt.f32 %v855_v0  ;;  %vm864_vm9 = vmor %vm862_vm8, %vm863_vm6  ;;  %vm872_vm11 = vweird.f32 %v855_v0 }
 0x762   :  { %v858_v1 = vmul.f32 %v1007_v63, %v857_v3 }
 0x764   :  { %v859_v4 = vmul.f32 0.5, %v858_v1 }
 0x766   :  { %v860_v7 = vsub.f32 1.5, %v859_v4 }
 0x767   :  { %v1009_v10 = vpop.eup %1008 }
 0x768   :  { %v861_v54 = vmul.f32 %v1007_v63, %v860_v7  ;;  %v867_v25 = vmul.f32 %v1009_v10, %v855_v0  ;;  %vm873_vm10 = vweird.f32 %v1009_v10 }
 0x769   :  { %vm874_vm12 = vmor %vm872_vm11, %vm873_vm10 }
 0x76a   :  { %v865_v62 = vsel %vm864_vm9, %v1007_v63, %v861_v54  ;;  %v868_v11 = vmul.f32 %v1009_v10, %v867_v25 }
 0x76b   :  { %v876_v6 = vmul.f32 %v865_v62, %v842_v48 }
 0x76c   :  { %v869_v58 = vmul.f32 0.5, %v868_v11 }
 0x76d   :  { %v879_v12 = vmul.f32 %v878_v45, %v876_v6 }
 0x76e   :  { %v870_v50 = vsub.f32 1.5, %v869_v58 }
 0x76f   :  { %v882_v2 = vadd.f32 %v881_v20, %v879_v12 }
 0x770   :  { %v871_v5 = vmul.f32 %v1009_v10, %v870_v50 }
 0x771   :  { %884 = vst.msk [vmem:[#allocation2] sm:$0xff] %vm90_vm7, %v882_v2 }
 0x772   :  { %v875_v13 = vsel %vm874_vm12, %v1009_v10, %v871_v5 }
 0x773   :  { %v877_v16 = vmul.f32 %v875_v13, %v843_v51 }
 0x775   :  { %v880_v9 = vmul.f32 %v878_v45, %v877_v16 }
 0x777   :  { %v883_v8 = vadd.f32 %v881_v20, %v880_v9 }
 0x779   :  { %885 = vst.msk [vmem:[#allocation2 + $0x8] sm:$0xff] %vm90_vm7, %v883_v8 }
 0x77a   :  { %898 = dma.vmem_to_hbm [thread:$0]  %s891_s4, 256, %s893_s9, [#allocation3], %s1040_s10, %s1040_s10, %s1041_s11  }
 0x77b   :  { %1034 = dma.done.wait [#allocation3], 256  }
 0x77c   :  { %1035 = vsyncadd [#allocation3], 4294967040 }
 0x77d   :  { %903 = vsyncpa [#allocation3], 1 }

</bundles_post_ra>
